<compile_context>
chip_gen: v7x
topology: tpu7x:2x2x1
jax: 0.10.0
libtpu: 0.0.40
codegen_flags: <defaults>
</compile_context>

<pallas_src>
import functools
import math

import jax
import jax.numpy as jnp
from jax.experimental import pallas as pl
from jax.experimental.pallas import tpu as pltpu


def _round_up(x, m):
    return (x + m - 1) // m * m


def _auto_tile(n, rows):
    """Pick the row tile from the actual per-core VMEM capacity."""
    try:
        vmem_cap = int(getattr(pltpu.get_tpu_info(), "vmem_capacity_bytes",
                               64 * 1024 * 1024))
    except Exception:
        vmem_cap = 64 * 1024 * 1024            # conservative (v7x) default
    n_lanes = _round_up(max(n, 1), 128)        # VMEM tiles are lane-padded to 128
    per_row = 20 * n_lanes * 4                 # ~live f32/i32 tiles per row (I/O dbuf + temps)
    tr = int(0.4 * vmem_cap) // per_row
    tr = max(8, min(tr, 1024))                 # keep several grid steps per TC (v7x)
    # aim for >= ~8 grid steps when the row count allows (pipelining + 2 TCs)
    tr = min(tr, max(8, _round_up(-(-rows // 8), 8)))
    tr = max(8, (tr // 8) * 8)
    return tr, per_row, vmem_cap


def local_policy_kernel(dist_ref, theta_ref, ins_ref, p1_ref, p2_ref, out_ref,
                        *, k, emb, penalty, low_bits, nonneg_dist):
    tr, n = dist_ref.shape
    d = dist_ref[...].astype(jnp.float32)      # (TR, N)
    th = theta_ref[...].astype(jnp.float32)    # (TR, N)

    iota = jax.lax.broadcasted_iota(jnp.int32, (tr, n), 1)
    int_max = jnp.int32(0x7FFFFFFF)
    pos_mask = jnp.int32(0x7FFFFFFF)
    high_mask = jnp.int32(~((1 << low_bits) - 1))

    # Ordered integer distance key.  For non-negative distances the raw bits
    # are already ordered; otherwise sign-fold first.
    dbits = pltpu.bitcast(d, jnp.int32)
    if not nonneg_dist:
        dbits = jnp.where(dbits < 0, dbits ^ pos_mask, dbits)
    # Combined key: truncated distance bits | lane index -> unique per lane,
    # lowest-index tie-break (matches lax.top_k / torch.topk).
    work = (dbits & high_mask) | iota

    sel_masks, dist_cols, theta_cols = [], [], []
    for _ in range(k):                          # k is small & static
        mkey = jnp.min(work, axis=-1, keepdims=True)          # XLU reduce
        sel = work == mkey                                     # strictly one-hot
        sel_masks.append(sel)
        db = mkey & high_mask                                  # drop index bits
        if not nonneg_dist:
            db = jnp.where(db < 0, db ^ pos_mask, db)
        dist_cols.append(pltpu.bitcast(db, jnp.float32))       # (TR, 1)
        # exact theta gather at the selected lane (no lane broadcast needed)
        theta_cols.append(jnp.min(jnp.where(sel, th, jnp.inf),
                                  axis=-1, keepdims=True))     # (TR, 1)
        work = jnp.where(sel, int_max, work)

    # normalize by the largest of the k smallest (ascending -> last column)
    dmax = dist_cols[-1]
    safe = jnp.where(dmax == 0.0, 1.0, dmax)   # guard; reference would be NaN here
    inv = 1.0 / safe

    # Linear1 as 2k+2 broadcast FMAs over (TR, emb) -- no tiny matmul, no concat.
    # x_in column order: [norm_dist_0..k-1, theta_0..k-1, ins0, ins1].
    p1 = p1_ref[...]                            # (2k+3, emb): W1^T rows + b1 row
    ins = ins_ref[...].astype(jnp.float32)      # (TR, 2)
    h = (p1[2 * k + 2:2 * k + 3, :]             # b1
         + ins[:, 0:1] * p1[2 * k:2 * k + 1, :]
         + ins[:, 1:2] * p1[2 * k + 1:2 * k + 2, :])
    nd_cols = []
    for j in range(k):
        nd = dist_cols[j] * inv
        nd_cols.append(nd)
        h = h + nd * p1[j:j + 1, :] + theta_cols[j] * p1[k + j:k + j + 1, :]

    # tanh-approximate GELU (EUP), then Linear2 on the MXU.
    c = 0.7978845608028654                      # sqrt(2/pi)
    h = 0.5 * h * (1.0 + jnp.tanh(c * (h + 0.044715 * h * h * h)))
    p2 = p2_ref[...]                            # (emb+1, k): W2^T + b2 row
    o = jnp.dot(h, p2[0:emb, :], preferred_element_type=jnp.float32) \
        + p2[emb:emb + 1, :]                    # (TR, k)

    # scatter: penalty everywhere, (MLP output - normalized dist) at top-k slots
    out = jnp.full((tr, n), penalty, dtype=jnp.float32)
    for j in range(k):
        out = jnp.where(sel_masks[j], o[:, j:j + 1] - nd_cols[j], out)
    out_ref[...] = out.astype(out_ref.dtype)


def local_policy_forward(theta, dist, ins_feature, W1, b1, W2, b2, penalty,
                         tr=None, nonneg_dist=True):
    """Pallas implementation of local_policy.forward (no-padding branch)."""
    B, P, N = dist.shape
    K, emb = W2.shape
    F = W1.shape[1]                       # 2*K + 2
    assert F == 2 * K + 2
    # TODO(synk): padding branch of the PyTorch forward (local_size > N) not implemented.
    assert K <= N, "padding branch (local_size > N) not implemented"

    R = B * P
    auto_tr, per_row, vmem_cap = _auto_tile(N, R)
    tr = auto_tr if tr is None else int(tr)
    if R >= 8:
        tr = max(8, (tr // 8) * 8)
        tr = min(tr, _round_up(R, 8))
    else:
        tr = R                            # block row dim == full array dim (legal)
    grid = -(-R // tr)                    # cdiv; partial last block is fine
    vmem_limit = int(min(0.75 * vmem_cap,
                         max(32 << 20, per_row * tr + (12 << 20))))

    d2 = dist.reshape(R, N).astype(jnp.float32)
    t2 = theta.reshape(R, N).astype(jnp.float32)
    ins01 = jnp.concatenate(
        [ins_feature[0].reshape(R, 1), ins_feature[1].reshape(R, 1)],
        axis=-1).astype(jnp.float32)

    # resident parameter blocks: W1^T | b1  and  W2^T | b2
    p1 = jnp.concatenate(
        [W1.T.astype(jnp.float32), b1.reshape(1, emb).astype(jnp.float32)], axis=0)
    p2 = jnp.concatenate(
        [W2.T.astype(jnp.float32), b2.reshape(1, K).astype(jnp.float32)], axis=0)

    low_bits = (N - 1).bit_length() if N > 1 else 0
    kernel = functools.partial(local_policy_kernel, k=K, emb=emb,
                               penalty=float(penalty), low_bits=low_bits,
                               nonneg_dist=bool(nonneg_dist))

    out = pl.pallas_call(
        kernel,
        out_shape=jax.ShapeDtypeStruct((R, N), jnp.float32),
        grid_spec=pltpu.PrefetchScalarGridSpec(
            num_scalar_prefetch=0,
            grid=(grid,),
            in_specs=[
                pl.BlockSpec((tr, N), lambda i: (i, 0)),        # dist rows
                pl.BlockSpec((tr, N), lambda i: (i, 0)),        # theta rows
                pl.BlockSpec((tr, 2), lambda i: (i, 0)),        # packed ins_feature
                pl.BlockSpec((F + 1, emb), lambda i: (0, 0)),   # W1^T | b1 (resident)
                pl.BlockSpec((emb + 1, K), lambda i: (0, 0)),   # W2^T | b2 (resident)
            ],
            out_specs=pl.BlockSpec((tr, N), lambda i: (i, 0)),
        ),
        compiler_params=pltpu.CompilerParams(
            dimension_semantics=("parallel",),
            vmem_limit_bytes=vmem_limit),
    )(d2, t2, ins01, p1, p2)

    return out.reshape(B, P, N)


def reference_forward(theta, dist, ins_feature, W1, b1, W2, b2, penalty):
    """Pure-JAX reference mirroring the PyTorch forward (no-padding branch)."""
    B, P, N = dist.shape
    K = W2.shape[0]
    neg_vals, idx = jax.lax.top_k(-dist, K)               # k smallest, ascending
    sorted_dist = -neg_vals
    sorted_dist = sorted_dist / jnp.max(sorted_dist, axis=-1, keepdims=True)
    sorted_theta = jnp.take_along_axis(theta, idx, axis=-1)
    x_in = jnp.concatenate(
        [sorted_dist, sorted_theta, ins_feature[0], ins_feature[1]], axis=-1)
    h = x_in @ W1.T + b1
    h = 0.5 * h * (1.0 + jax.lax.erf(h * 0.7071067811865476))
    o = h @ W2.T + b2 - sorted_dist
    base = jnp.full((B * P, N), penalty, jnp.float32)
    out = jax.vmap(lambda b_, i_, o_: b_.at[i_].set(o_))(
        base, idx.reshape(B * P, K), o.reshape(B * P, K))
    return out.reshape(B, P, N)


if __name__ == "__main__":
    # model_params: ff_hidden_dim=32, xi=-10.0, local_size[idx]=5 -> K = 6
    B, P, N = 2, 8, 16
    LOCAL_SIZE_PARAM = 5
    K = LOCAL_SIZE_PARAM + 1
    EMB = 32
    XI = -10.0

    key = jax.random.PRNGKey(0)
    k_dist, k_theta, k_ins, k_w1, k_b1, k_w2, k_b2 = jax.random.split(key, 7)

    dist = jax.random.uniform(k_dist, (B, P, N), jnp.float32, 0.05, 2.0)
    theta = jax.random.uniform(k_theta, (B, P, N), jnp.float32, -math.pi, math.pi)
    ins = jax.random.uniform(k_ins, (2, B, P, 1), jnp.float32)
    ins_feature = (ins[0], ins[1])

    fan_in1 = 2 * K + 2
    lim1 = 1.0 / math.sqrt(fan_in1)
    W1 = jax.random.uniform(k_w1, (EMB, fan_in1), jnp.float32, -lim1, lim1)
    b1 = jax.random.uniform(k_b1, (EMB,), jnp.float32, -lim1, lim1)
    lim2 = 1.0 / math.sqrt(EMB)
    W2 = jax.random.uniform(k_w2, (K, EMB), jnp.float32, -lim2, lim2)
    b2 = jax.random.uniform(k_b2, (K,), jnp.float32, -lim2, lim2)

    out = jax.block_until_ready(
        local_policy_forward(theta, dist, ins_feature, W1, b1, W2, b2, XI))
    ref = jax.block_until_ready(
        reference_forward(theta, dist, ins_feature, W1, b1, W2, b2, XI))

    assert out.shape == (B, P, N)
    err = float(jnp.max(jnp.abs(out - ref)))
    assert err < 5e-2, f"max abs error too large: {err}"
    print("KERNEL_OK")
</pallas_src>

<mosaic_0001>
module attributes {stable_mosaic.version = 11 : i64} {
  func.func @local_policy_kernel(%arg0: i32, %arg1: memref<8x16xf32, #tpu.memory_space<vmem>>, %arg2: memref<8x16xf32, #tpu.memory_space<vmem>>, %arg3: memref<8x2xf32, #tpu.memory_space<vmem>>, %arg4: memref<15x32xf32, #tpu.memory_space<vmem>>, %arg5: memref<33x6xf32, #tpu.memory_space<vmem>>, %arg6: memref<8x16xf32, #tpu.memory_space<vmem>>) attributes {dimension_semantics = [#tpu.dimension_semantics<parallel>], iteration_bounds = array<i64: 2>, scalar_prefetch = 0 : i64, scratch_operands = 0 : i64, tpu.core_type = #tpu.core_type<tc>, window_params = [{transform_indices = @transform_0, window_bounds = array<i64: 8, 16>}, {transform_indices = @transform_1, window_bounds = array<i64: 8, 16>}, {transform_indices = @transform_2, window_bounds = array<i64: 8, 2>}, {pipeline_mode = #tpu.pipeline_mode<synchronous>, transform_indices = @transform_3, window_bounds = array<i64: 15, 32>}, {pipeline_mode = #tpu.pipeline_mode<synchronous>, transform_indices = @transform_4, window_bounds = array<i64: 33, 6>}, {transform_indices = @transform_5, window_bounds = array<i64: 8, 16>}]} {
    %c0 = arith.constant 0 : index
    %c0_0 = arith.constant 0 : index
    %0 = vector.load %arg1[%c0, %c0_0] : memref<8x16xf32, #tpu.memory_space<vmem>>, vector<8x16xf32>
    %c0_1 = arith.constant 0 : index
    %c0_2 = arith.constant 0 : index
    %1 = vector.load %arg2[%c0_1, %c0_2] : memref<8x16xf32, #tpu.memory_space<vmem>>, vector<8x16xf32>
    %2 = tpu.iota {dimensions = array<i32: 1>} : vector<8x16xi32>
    %3 = tpu.bitcast %0 : vector<8x16xf32> -> vector<8x16xi32>
    %c-16_i32 = arith.constant -16 : i32
    %4 = vector.broadcast %c-16_i32 : i32 to vector<8x16xi32>
    %5 = arith.andi %3, %4 : vector<8x16xi32>
    %6 = arith.ori %5, %2 : vector<8x16xi32>
    %cst = arith.constant dense<2147483647> : vector<8xi32>
    %7 = vector.multi_reduction <minsi>, %6, %cst [1] : vector<8x16xi32> to vector<8xi32>
    %8 = vector.shape_cast %7 : vector<8xi32> to vector<8x1xi32>
    %9 = vector.broadcast %8 : vector<8x1xi32> to vector<8x16xi32>
    %10 = arith.cmpi eq, %6, %9 : vector<8x16xi32>
    %c-16_i32_3 = arith.constant -16 : i32
    %11 = vector.broadcast %c-16_i32_3 : i32 to vector<8x1xi32>
    %12 = arith.andi %8, %11 : vector<8x1xi32>
    %13 = tpu.bitcast %12 : vector<8x1xi32> -> vector<8x1xf32>
    %cst_4 = arith.constant 0x7F800000 : f32
    %14 = vector.broadcast %cst_4 : f32 to vector<8x16xf32>
    %15 = arith.select %10, %1, %14 : vector<8x16xi1>, vector<8x16xf32>
    %cst_5 = arith.constant dense<0x7F800000> : vector<8xf32>
    %16 = vector.multi_reduction <minimumf>, %15, %cst_5 [1] : vector<8x16xf32> to vector<8xf32>
    %17 = vector.shape_cast %16 : vector<8xf32> to vector<8x1xf32>
    %c2147483647_i32 = arith.constant 2147483647 : i32
    %18 = vector.broadcast %c2147483647_i32 : i32 to vector<8x16xi32>
    %19 = arith.select %10, %18, %6 : vector<8x16xi1>, vector<8x16xi32>
    %cst_6 = arith.constant dense<2147483647> : vector<8xi32>
    %20 = vector.multi_reduction <minsi>, %19, %cst_6 [1] : vector<8x16xi32> to vector<8xi32>
    %21 = vector.shape_cast %20 : vector<8xi32> to vector<8x1xi32>
    %22 = vector.broadcast %21 : vector<8x1xi32> to vector<8x16xi32>
    %23 = arith.cmpi eq, %19, %22 : vector<8x16xi32>
    %c-16_i32_7 = arith.constant -16 : i32
    %24 = vector.broadcast %c-16_i32_7 : i32 to vector<8x1xi32>
    %25 = arith.andi %21, %24 : vector<8x1xi32>
    %26 = tpu.bitcast %25 : vector<8x1xi32> -> vector<8x1xf32>
    %cst_8 = arith.constant 0x7F800000 : f32
    %27 = vector.broadcast %cst_8 : f32 to vector<8x16xf32>
    %28 = arith.select %23, %1, %27 : vector<8x16xi1>, vector<8x16xf32>
    %cst_9 = arith.constant dense<0x7F800000> : vector<8xf32>
    %29 = vector.multi_reduction <minimumf>, %28, %cst_9 [1] : vector<8x16xf32> to vector<8xf32>
    %30 = vector.shape_cast %29 : vector<8xf32> to vector<8x1xf32>
    %c2147483647_i32_10 = arith.constant 2147483647 : i32
    %31 = vector.broadcast %c2147483647_i32_10 : i32 to vector<8x16xi32>
    %32 = arith.select %23, %31, %19 : vector<8x16xi1>, vector<8x16xi32>
    %cst_11 = arith.constant dense<2147483647> : vector<8xi32>
    %33 = vector.multi_reduction <minsi>, %32, %cst_11 [1] : vector<8x16xi32> to vector<8xi32>
    %34 = vector.shape_cast %33 : vector<8xi32> to vector<8x1xi32>
    %35 = vector.broadcast %34 : vector<8x1xi32> to vector<8x16xi32>
    %36 = arith.cmpi eq, %32, %35 : vector<8x16xi32>
    %c-16_i32_12 = arith.constant -16 : i32
    %37 = vector.broadcast %c-16_i32_12 : i32 to vector<8x1xi32>
    %38 = arith.andi %34, %37 : vector<8x1xi32>
    %39 = tpu.bitcast %38 : vector<8x1xi32> -> vector<8x1xf32>
    %cst_13 = arith.constant 0x7F800000 : f32
    %40 = vector.broadcast %cst_13 : f32 to vector<8x16xf32>
    %41 = arith.select %36, %1, %40 : vector<8x16xi1>, vector<8x16xf32>
    %cst_14 = arith.constant dense<0x7F800000> : vector<8xf32>
    %42 = vector.multi_reduction <minimumf>, %41, %cst_14 [1] : vector<8x16xf32> to vector<8xf32>
    %43 = vector.shape_cast %42 : vector<8xf32> to vector<8x1xf32>
    %c2147483647_i32_15 = arith.constant 2147483647 : i32
    %44 = vector.broadcast %c2147483647_i32_15 : i32 to vector<8x16xi32>
    %45 = arith.select %36, %44, %32 : vector<8x16xi1>, vector<8x16xi32>
    %cst_16 = arith.constant dense<2147483647> : vector<8xi32>
    %46 = vector.multi_reduction <minsi>, %45, %cst_16 [1] : vector<8x16xi32> to vector<8xi32>
    %47 = vector.shape_cast %46 : vector<8xi32> to vector<8x1xi32>
    %48 = vector.broadcast %47 : vector<8x1xi32> to vector<8x16xi32>
    %49 = arith.cmpi eq, %45, %48 : vector<8x16xi32>
    %c-16_i32_17 = arith.constant -16 : i32
    %50 = vector.broadcast %c-16_i32_17 : i32 to vector<8x1xi32>
    %51 = arith.andi %47, %50 : vector<8x1xi32>
    %52 = tpu.bitcast %51 : vector<8x1xi32> -> vector<8x1xf32>
    %cst_18 = arith.constant 0x7F800000 : f32
    %53 = vector.broadcast %cst_18 : f32 to vector<8x16xf32>
    %54 = arith.select %49, %1, %53 : vector<8x16xi1>, vector<8x16xf32>
    %cst_19 = arith.constant dense<0x7F800000> : vector<8xf32>
    %55 = vector.multi_reduction <minimumf>, %54, %cst_19 [1] : vector<8x16xf32> to vector<8xf32>
    %56 = vector.shape_cast %55 : vector<8xf32> to vector<8x1xf32>
    %c2147483647_i32_20 = arith.constant 2147483647 : i32
    %57 = vector.broadcast %c2147483647_i32_20 : i32 to vector<8x16xi32>
    %58 = arith.select %49, %57, %45 : vector<8x16xi1>, vector<8x16xi32>
    %cst_21 = arith.constant dense<2147483647> : vector<8xi32>
    %59 = vector.multi_reduction <minsi>, %58, %cst_21 [1] : vector<8x16xi32> to vector<8xi32>
    %60 = vector.shape_cast %59 : vector<8xi32> to vector<8x1xi32>
    %61 = vector.broadcast %60 : vector<8x1xi32> to vector<8x16xi32>
    %62 = arith.cmpi eq, %58, %61 : vector<8x16xi32>
    %c-16_i32_22 = arith.constant -16 : i32
    %63 = vector.broadcast %c-16_i32_22 : i32 to vector<8x1xi32>
    %64 = arith.andi %60, %63 : vector<8x1xi32>
    %65 = tpu.bitcast %64 : vector<8x1xi32> -> vector<8x1xf32>
    %cst_23 = arith.constant 0x7F800000 : f32
    %66 = vector.broadcast %cst_23 : f32 to vector<8x16xf32>
    %67 = arith.select %62, %1, %66 : vector<8x16xi1>, vector<8x16xf32>
    %cst_24 = arith.constant dense<0x7F800000> : vector<8xf32>
    %68 = vector.multi_reduction <minimumf>, %67, %cst_24 [1] : vector<8x16xf32> to vector<8xf32>
    %69 = vector.shape_cast %68 : vector<8xf32> to vector<8x1xf32>
    %c2147483647_i32_25 = arith.constant 2147483647 : i32
    %70 = vector.broadcast %c2147483647_i32_25 : i32 to vector<8x16xi32>
    %71 = arith.select %62, %70, %58 : vector<8x16xi1>, vector<8x16xi32>
    %cst_26 = arith.constant dense<2147483647> : vector<8xi32>
    %72 = vector.multi_reduction <minsi>, %71, %cst_26 [1] : vector<8x16xi32> to vector<8xi32>
    %73 = vector.shape_cast %72 : vector<8xi32> to vector<8x1xi32>
    %74 = vector.broadcast %73 : vector<8x1xi32> to vector<8x16xi32>
    %75 = arith.cmpi eq, %71, %74 : vector<8x16xi32>
    %c-16_i32_27 = arith.constant -16 : i32
    %76 = vector.broadcast %c-16_i32_27 : i32 to vector<8x1xi32>
    %77 = arith.andi %73, %76 : vector<8x1xi32>
    %78 = tpu.bitcast %77 : vector<8x1xi32> -> vector<8x1xf32>
    %cst_28 = arith.constant 0x7F800000 : f32
    %79 = vector.broadcast %cst_28 : f32 to vector<8x16xf32>
    %80 = arith.select %75, %1, %79 : vector<8x16xi1>, vector<8x16xf32>
    %cst_29 = arith.constant dense<0x7F800000> : vector<8xf32>
    %81 = vector.multi_reduction <minimumf>, %80, %cst_29 [1] : vector<8x16xf32> to vector<8xf32>
    %82 = vector.shape_cast %81 : vector<8xf32> to vector<8x1xf32>
    %cst_30 = arith.constant 0.000000e+00 : f32
    %83 = vector.broadcast %cst_30 : f32 to vector<8x1xf32>
    %84 = arith.cmpf oeq, %78, %83 : vector<8x1xf32>
    %cst_31 = arith.constant 1.000000e+00 : f32
    %85 = vector.broadcast %cst_31 : f32 to vector<8x1xf32>
    %86 = arith.select %84, %85, %78 : vector<8x1xi1>, vector<8x1xf32>
    %cst_32 = arith.constant 1.000000e+00 : f32
    %87 = vector.broadcast %cst_32 : f32 to vector<8x1xf32>
    %88 = arith.divf %87, %86 : vector<8x1xf32>
    %c0_33 = arith.constant 0 : index
    %c0_34 = arith.constant 0 : index
    %89 = vector.load %arg4[%c0_33, %c0_34] : memref<15x32xf32, #tpu.memory_space<vmem>>, vector<15x32xf32>
    %c0_35 = arith.constant 0 : index
    %c0_36 = arith.constant 0 : index
    %90 = vector.load %arg3[%c0_35, %c0_36] : memref<8x2xf32, #tpu.memory_space<vmem>>, vector<8x2xf32>
    %91 = vector.extract_strided_slice %89 {offsets = [14, 0], sizes = [1, 32], strides = [1, 1]} : vector<15x32xf32> to vector<1x32xf32>
    %92 = vector.extract_strided_slice %90 {offsets = [0, 0], sizes = [8, 1], strides = [1, 1]} : vector<8x2xf32> to vector<8x1xf32>
    %93 = vector.extract_strided_slice %89 {offsets = [12, 0], sizes = [1, 32], strides = [1, 1]} : vector<15x32xf32> to vector<1x32xf32>
    %94 = vector.broadcast %92 : vector<8x1xf32> to vector<8x32xf32>
    %95 = vector.broadcast %93 : vector<1x32xf32> to vector<8x32xf32>
    %96 = arith.mulf %94, %95 : vector<8x32xf32>
    %97 = vector.broadcast %91 : vector<1x32xf32> to vector<8x32xf32>
    %98 = arith.addf %97, %96 : vector<8x32xf32>
    %99 = vector.extract_strided_slice %90 {offsets = [0, 1], sizes = [8, 1], strides = [1, 1]} : vector<8x2xf32> to vector<8x1xf32>
    %100 = vector.extract_strided_slice %89 {offsets = [13, 0], sizes = [1, 32], strides = [1, 1]} : vector<15x32xf32> to vector<1x32xf32>
    %101 = vector.broadcast %99 : vector<8x1xf32> to vector<8x32xf32>
    %102 = vector.broadcast %100 : vector<1x32xf32> to vector<8x32xf32>
    %103 = arith.mulf %101, %102 : vector<8x32xf32>
    %104 = arith.addf %98, %103 : vector<8x32xf32>
    %105 = arith.mulf %13, %88 : vector<8x1xf32>
    %106 = vector.extract_strided_slice %89 {offsets = [0, 0], sizes = [1, 32], strides = [1, 1]} : vector<15x32xf32> to vector<1x32xf32>
    %107 = vector.broadcast %105 : vector<8x1xf32> to vector<8x32xf32>
    %108 = vector.broadcast %106 : vector<1x32xf32> to vector<8x32xf32>
    %109 = arith.mulf %107, %108 : vector<8x32xf32>
    %110 = arith.addf %104, %109 : vector<8x32xf32>
    %111 = vector.extract_strided_slice %89 {offsets = [6, 0], sizes = [1, 32], strides = [1, 1]} : vector<15x32xf32> to vector<1x32xf32>
    %112 = vector.broadcast %17 : vector<8x1xf32> to vector<8x32xf32>
    %113 = vector.broadcast %111 : vector<1x32xf32> to vector<8x32xf32>
    %114 = arith.mulf %112, %113 : vector<8x32xf32>
    %115 = arith.addf %110, %114 : vector<8x32xf32>
    %116 = arith.mulf %26, %88 : vector<8x1xf32>
    %117 = vector.extract_strided_slice %89 {offsets = [1, 0], sizes = [1, 32], strides = [1, 1]} : vector<15x32xf32> to vector<1x32xf32>
    %118 = vector.broadcast %116 : vector<8x1xf32> to vector<8x32xf32>
    %119 = vector.broadcast %117 : vector<1x32xf32> to vector<8x32xf32>
    %120 = arith.mulf %118, %119 : vector<8x32xf32>
    %121 = arith.addf %115, %120 : vector<8x32xf32>
    %122 = vector.extract_strided_slice %89 {offsets = [7, 0], sizes = [1, 32], strides = [1, 1]} : vector<15x32xf32> to vector<1x32xf32>
    %123 = vector.broadcast %30 : vector<8x1xf32> to vector<8x32xf32>
    %124 = vector.broadcast %122 : vector<1x32xf32> to vector<8x32xf32>
    %125 = arith.mulf %123, %124 : vector<8x32xf32>
    %126 = arith.addf %121, %125 : vector<8x32xf32>
    %127 = arith.mulf %39, %88 : vector<8x1xf32>
    %128 = vector.extract_strided_slice %89 {offsets = [2, 0], sizes = [1, 32], strides = [1, 1]} : vector<15x32xf32> to vector<1x32xf32>
    %129 = vector.broadcast %127 : vector<8x1xf32> to vector<8x32xf32>
    %130 = vector.broadcast %128 : vector<1x32xf32> to vector<8x32xf32>
    %131 = arith.mulf %129, %130 : vector<8x32xf32>
    %132 = arith.addf %126, %131 : vector<8x32xf32>
    %133 = vector.extract_strided_slice %89 {offsets = [8, 0], sizes = [1, 32], strides = [1, 1]} : vector<15x32xf32> to vector<1x32xf32>
    %134 = vector.broadcast %43 : vector<8x1xf32> to vector<8x32xf32>
    %135 = vector.broadcast %133 : vector<1x32xf32> to vector<8x32xf32>
    %136 = arith.mulf %134, %135 : vector<8x32xf32>
    %137 = arith.addf %132, %136 : vector<8x32xf32>
    %138 = arith.mulf %52, %88 : vector<8x1xf32>
    %139 = vector.extract_strided_slice %89 {offsets = [3, 0], sizes = [1, 32], strides = [1, 1]} : vector<15x32xf32> to vector<1x32xf32>
    %140 = vector.broadcast %138 : vector<8x1xf32> to vector<8x32xf32>
    %141 = vector.broadcast %139 : vector<1x32xf32> to vector<8x32xf32>
    %142 = arith.mulf %140, %141 : vector<8x32xf32>
    %143 = arith.addf %137, %142 : vector<8x32xf32>
    %144 = vector.extract_strided_slice %89 {offsets = [9, 0], sizes = [1, 32], strides = [1, 1]} : vector<15x32xf32> to vector<1x32xf32>
    %145 = vector.broadcast %56 : vector<8x1xf32> to vector<8x32xf32>
    %146 = vector.broadcast %144 : vector<1x32xf32> to vector<8x32xf32>
    %147 = arith.mulf %145, %146 : vector<8x32xf32>
    %148 = arith.addf %143, %147 : vector<8x32xf32>
    %149 = arith.mulf %65, %88 : vector<8x1xf32>
    %150 = vector.extract_strided_slice %89 {offsets = [4, 0], sizes = [1, 32], strides = [1, 1]} : vector<15x32xf32> to vector<1x32xf32>
    %151 = vector.broadcast %149 : vector<8x1xf32> to vector<8x32xf32>
    %152 = vector.broadcast %150 : vector<1x32xf32> to vector<8x32xf32>
    %153 = arith.mulf %151, %152 : vector<8x32xf32>
    %154 = arith.addf %148, %153 : vector<8x32xf32>
    %155 = vector.extract_strided_slice %89 {offsets = [10, 0], sizes = [1, 32], strides = [1, 1]} : vector<15x32xf32> to vector<1x32xf32>
    %156 = vector.broadcast %69 : vector<8x1xf32> to vector<8x32xf32>
    %157 = vector.broadcast %155 : vector<1x32xf32> to vector<8x32xf32>
    %158 = arith.mulf %156, %157 : vector<8x32xf32>
    %159 = arith.addf %154, %158 : vector<8x32xf32>
    %160 = arith.mulf %78, %88 : vector<8x1xf32>
    %161 = vector.extract_strided_slice %89 {offsets = [5, 0], sizes = [1, 32], strides = [1, 1]} : vector<15x32xf32> to vector<1x32xf32>
    %162 = vector.broadcast %160 : vector<8x1xf32> to vector<8x32xf32>
    %163 = vector.broadcast %161 : vector<1x32xf32> to vector<8x32xf32>
    %164 = arith.mulf %162, %163 : vector<8x32xf32>
    %165 = arith.addf %159, %164 : vector<8x32xf32>
    %166 = vector.extract_strided_slice %89 {offsets = [11, 0], sizes = [1, 32], strides = [1, 1]} : vector<15x32xf32> to vector<1x32xf32>
    %167 = vector.broadcast %82 : vector<8x1xf32> to vector<8x32xf32>
    %168 = vector.broadcast %166 : vector<1x32xf32> to vector<8x32xf32>
    %169 = arith.mulf %167, %168 : vector<8x32xf32>
    %170 = arith.addf %165, %169 : vector<8x32xf32>
    %cst_37 = arith.constant 5.000000e-01 : f32
    %171 = vector.broadcast %cst_37 : f32 to vector<8x32xf32>
    %172 = arith.mulf %171, %170 : vector<8x32xf32>
    %cst_38 = arith.constant 4.471500e-02 : f32
    %173 = vector.broadcast %cst_38 : f32 to vector<8x32xf32>
    %174 = arith.mulf %173, %170 : vector<8x32xf32>
    %175 = arith.mulf %174, %170 : vector<8x32xf32>
    %176 = arith.mulf %175, %170 : vector<8x32xf32>
    %177 = arith.addf %170, %176 : vector<8x32xf32>
    %cst_39 = arith.constant 0.797884583 : f32
    %178 = vector.broadcast %cst_39 : f32 to vector<8x32xf32>
    %179 = arith.mulf %178, %177 : vector<8x32xf32>
    %180 = math.tanh %179 : vector<8x32xf32>
    %cst_40 = arith.constant 1.000000e+00 : f32
    %181 = vector.broadcast %cst_40 : f32 to vector<8x32xf32>
    %182 = arith.addf %181, %180 : vector<8x32xf32>
    %183 = arith.mulf %172, %182 : vector<8x32xf32>
    %c0_41 = arith.constant 0 : index
    %c0_42 = arith.constant 0 : index
    %184 = vector.load %arg5[%c0_41, %c0_42] : memref<33x6xf32, #tpu.memory_space<vmem>>, vector<33x6xf32>
    %185 = vector.extract_strided_slice %184 {offsets = [0, 0], sizes = [32, 6], strides = [1, 1]} : vector<33x6xf32> to vector<32x6xf32>
    %cst_43 = arith.constant dense<0.000000e+00> : vector<8x6xf32>
    %186 = tpu.matmul %183, %185, %cst_43 {dimension_numbers = #tpu.dot_dimension_numbers<[1], [0], [0], [1], [0, 0, 1, 1], [], []>} : vector<8x32xf32>, vector<32x6xf32>, vector<8x6xf32> -> vector<8x6xf32>
    %187 = vector.extract_strided_slice %184 {offsets = [32, 0], sizes = [1, 6], strides = [1, 1]} : vector<33x6xf32> to vector<1x6xf32>
    %188 = vector.broadcast %187 : vector<1x6xf32> to vector<8x6xf32>
    %189 = arith.addf %186, %188 : vector<8x6xf32>
    %cst_44 = arith.constant -1.000000e+01 : f32
    %190 = vector.broadcast %cst_44 : f32 to vector<8x16xf32>
    %191 = vector.extract_strided_slice %189 {offsets = [0, 0], sizes = [8, 1], strides = [1, 1]} : vector<8x6xf32> to vector<8x1xf32>
    %192 = arith.subf %191, %105 : vector<8x1xf32>
    %193 = vector.shape_cast %192 : vector<8x1xf32> to vector<8x1xf32>
    %194 = vector.broadcast %193 : vector<8x1xf32> to vector<8x16xf32>
    %195 = arith.select %10, %194, %190 : vector<8x16xi1>, vector<8x16xf32>
    %196 = vector.extract_strided_slice %189 {offsets = [0, 1], sizes = [8, 1], strides = [1, 1]} : vector<8x6xf32> to vector<8x1xf32>
    %197 = arith.subf %196, %116 : vector<8x1xf32>
    %198 = vector.shape_cast %197 : vector<8x1xf32> to vector<8x1xf32>
    %199 = vector.broadcast %198 : vector<8x1xf32> to vector<8x16xf32>
    %200 = arith.select %23, %199, %195 : vector<8x16xi1>, vector<8x16xf32>
    %201 = vector.extract_strided_slice %189 {offsets = [0, 2], sizes = [8, 1], strides = [1, 1]} : vector<8x6xf32> to vector<8x1xf32>
    %202 = arith.subf %201, %127 : vector<8x1xf32>
    %203 = vector.shape_cast %202 : vector<8x1xf32> to vector<8x1xf32>
    %204 = vector.broadcast %203 : vector<8x1xf32> to vector<8x16xf32>
    %205 = arith.select %36, %204, %200 : vector<8x16xi1>, vector<8x16xf32>
    %206 = vector.extract_strided_slice %189 {offsets = [0, 3], sizes = [8, 1], strides = [1, 1]} : vector<8x6xf32> to vector<8x1xf32>
    %207 = arith.subf %206, %138 : vector<8x1xf32>
    %208 = vector.shape_cast %207 : vector<8x1xf32> to vector<8x1xf32>
    %209 = vector.broadcast %208 : vector<8x1xf32> to vector<8x16xf32>
    %210 = arith.select %49, %209, %205 : vector<8x16xi1>, vector<8x16xf32>
    %211 = vector.extract_strided_slice %189 {offsets = [0, 4], sizes = [8, 1], strides = [1, 1]} : vector<8x6xf32> to vector<8x1xf32>
    %212 = arith.subf %211, %149 : vector<8x1xf32>
    %213 = vector.shape_cast %212 : vector<8x1xf32> to vector<8x1xf32>
    %214 = vector.broadcast %213 : vector<8x1xf32> to vector<8x16xf32>
    %215 = arith.select %62, %214, %210 : vector<8x16xi1>, vector<8x16xf32>
    %216 = vector.extract_strided_slice %189 {offsets = [0, 5], sizes = [8, 1], strides = [1, 1]} : vector<8x6xf32> to vector<8x1xf32>
    %217 = arith.subf %216, %160 : vector<8x1xf32>
    %218 = vector.shape_cast %217 : vector<8x1xf32> to vector<8x1xf32>
    %219 = vector.broadcast %218 : vector<8x1xf32> to vector<8x16xf32>
    %220 = arith.select %75, %219, %215 : vector<8x16xi1>, vector<8x16xf32>
    %c0_45 = arith.constant 0 : index
    %c0_46 = arith.constant 0 : index
    %221 = vector.load %arg6[%c0_45, %c0_46] : memref<8x16xf32, #tpu.memory_space<vmem>>, vector<8x16xf32>
    tpu.vector_store %arg6[%c0_45, %c0_46], %220 {strides = array<i32>} : memref<8x16xf32, #tpu.memory_space<vmem>>, vector<8x16xf32>,
    return
  }
  func.func @transform_0(%arg0: i32) -> (i32, i32) {
    %c0_i32 = arith.constant 0 : i32
    %c0_i32_0 = arith.constant 0 : i32
    return %arg0, %c0_i32 : i32, i32
  }
  func.func @transform_1(%arg0: i32) -> (i32, i32) {
    %c0_i32 = arith.constant 0 : i32
    %c0_i32_0 = arith.constant 0 : i32
    return %arg0, %c0_i32 : i32, i32
  }
  func.func @transform_2(%arg0: i32) -> (i32, i32) {
    %c0_i32 = arith.constant 0 : i32
    %c0_i32_0 = arith.constant 0 : i32
    return %arg0, %c0_i32 : i32, i32
  }
  func.func @transform_3(%arg0: i32) -> (i32, i32) {
    %c0_i32 = arith.constant 0 : i32
    %c0_i32_0 = arith.constant 0 : i32
    %c0_i32_1 = arith.constant 0 : i32
    return %c0_i32, %c0_i32_0 : i32, i32
  }
  func.func @transform_4(%arg0: i32) -> (i32, i32) {
    %c0_i32 = arith.constant 0 : i32
    %c0_i32_0 = arith.constant 0 : i32
    %c0_i32_1 = arith.constant 0 : i32
    return %c0_i32, %c0_i32_0 : i32, i32
  }
  func.func @transform_5(%arg0: i32) -> (i32, i32) {
    %c0_i32 = arith.constant 0 : i32
    %c0_i32_0 = arith.constant 0 : i32
    return %arg0, %c0_i32 : i32, i32
  }
}

</mosaic_0001>

<bundles_post_ra>
// kernel: tpu_custom_call.1
= control target key start
LH: loop header
LB: loop body
LE: loop exit
PB: predicated region body
PF: predicated region fallthrough
CT: control target
= control target key end

     0   :  { %10 = vsyncpa [#allocation3], 0  ;;  %s1224_s0 = inlined_call_operand.vmem [shape: f32[16,16], index: 0, kind: input, shape index: {}]   ;;  %s1225_s1 = inlined_call_operand.vmem [shape: f32[16,16], index: 1, kind: input, shape index: {}]   ;;  %s1226_s2 = inlined_call_operand.vmem [shape: f32[16,2], index: 2, kind: input, shape index: {}]   ;;  %s1227_s3 = inlined_call_operand.vmem [shape: f32[15,32], index: 3, kind: input, shape index: {}]   ;;  %s1228_s4 = inlined_call_operand.vmem [shape: f32[33,6], index: 4, kind: input, shape index: {}]   ;;  %s1229_s5 = inlined_call_operand.hbm [shape: f32[16,16], index: 5, kind: output, shape index: {}]  }
   0x1   :  { %12 = vsyncpa [#allocation3 + $0x1], 0  ;;  %s940_s18 = smov 0   ;;  %s942_s19 = smov 0  }
   0x2   :  { %s944_s20 = smov 0   ;;  %s946_s21 = smov 0  }
   0x3 LB: > { %s961_s22 = sadd.s32 4294967295, %s898_s21   ;;  %s741_s23 = sadd.s32 4294967294, %s898_s21   ;;  %s898_s21 = sphi %s946_s21, %s1235_s21   ;;  %s894_s20 = sphi %s944_s20, %s1234_s20   ;;  %s890_s19 = sphi %s942_s19, %s1233_s19   ;;  %s886_s18 = sphi %s940_s18, %s1232_s18  }
   0x4   : > { %s965_s24 = sadd.s32 1, %s898_s21   ;;  %s145_s25 = sadd.s32 1, %s894_s20 }
   0x5   : > { %s142_s26 = ssub.s32 %s898_s21, %s965_s24  ;;  %p155_p0 = scmp.ne.s32.totalorder %s894_s20, %s890_s19 }
   0x6   : > { %p143_p1 = scmp.eq.s32.totalorder %s142_s26, 0  ;;  %p156_p2 = scmp.eq.s32.totalorder %s961_s22, 1 }
   0x7   : > { %p161_p3 = scmp.ne.s32.totalorder %s890_s19, %s886_s18  ;;  %p162_p4 = scmp.eq.s32.totalorder %s741_s23, 1 }
   0x8   : > { %s976_s27 = scalar_select %p143_p1, %s894_s20, %s145_s25  }
   0x9   : > { %p978_p5 = por %p156_p2, %p155_p0  ;;  %p982_p6 = por %p162_p4, %p161_p3 }
   0xa   : > { %p744_p7 = scmp.ge.s32.totalorder %s898_s21, 1  ;;  %p207_p8 = scmp.lt.s32.totalorder %s898_s21, 3 }
   0xc   : > { %p208_p9 = pnand %p744_p7, %p207_p8 }
   0xd   : > { %p242_p10 = scmp.lt.s32.totalorder (!%p208_p9), %s961_s22, 1  ;;  %v256_v0 = vlaneseq (!%p208_p9)  ;;  %vm261_vm0 = vcmask (!%p208_p9), 130048   ;;  %vm903_vm14 = vmmov (!%p208_p9), 0   ;;  %vm527_vm15 = vcmask (!%p208_p9), 261120   ;;  %s239_s14 = sand.u32 (!%p208_p9), 1, %s890_s19  }
   0xe   : > { %211 = sbr.rel (%p208_p9) target bundleno = 2363 (0x93b), region = 40  ;;  %s752_s16 = sshll.u32 (!%p208_p9), %s961_s22, 7 }
   0xf   : > { %v257_v1 = vand.u32 (!%p208_p9), 127, %v256_v0  ;;  %s909_s7 = smov (!%p208_p9), [#allocation2]  }
  0x10   : > { %s840_s8 = sshll.u32 (!%p208_p9), %s909_s7, 4  ;;  %s841_s8 = int_to_ptr.vmem [resolvable:$false] %s840_s8 }
  0x15   : > { %s243_s30 = scalar_select %p242_p10, %s961_s22, 1 }
  0x16   : > { %s645_s22 = scalar_lea.sflag [#allocation3], %s239_s14 }
  0x17   : > { %s990_s6 = sshll.u32 %s243_s30, 3  ;;  %s1178_s30 = scalar_lea.hbm %s1229_s5, %s752_s16 }
  0x18   : > { %s245_s9 = scalar_lea.vmem %s1224_s0, %s990_s6  ;;  %s249_s12 = scalar_lea.vmem %s1225_s1, %s990_s6 }
  0x19   : > { %v254_v2 = vld [vmem:[%s245_s9] sm:$0xff]  ;;  %s253_s15 = scalar_lea.vmem %s1226_s2, %s990_s6  ;;  %s842_s9 = scalar_lea.vmem %s841_s8, 256 }
  0x1a   : > { %v259_v3 = vand.u32 4294967280, %v254_v2 }
  0x1c   : > { %v997_v4 = vor.u32 %v259_v3, %v257_v1  ;;  %v900_v1 = vmov 1  }
  0x1d   : > { %826 = vset.pattern.permute.xlu0 %v900_v1 }
  0x1e   : > { %v262_v5 = vsel %vm261_vm0, %v997_v4, 2147483647 }
  0x1f   : > { %v264_v6 = vshra.s32 %v262_v5, 16  ;;  %v263_v8 = vand.u32 65535, %v262_v5 }
  0x21   : > { %v266_v7 = vcvt.s32.f32 %v264_v6  ;;  %v265_v9 = vcvt.s32.f32 %v263_v8 }
  0x23   : > { %267 = vmin.xlane.f32.xlu0 %v266_v7 }
  0xb0   : > { %v268_v10 = vpop.xlane.xlu0 %267 }
  0xb1   : > { %vm269_vm1 = vcmp.eq.f32.partialorder %v266_v7, %v268_v10  ;;  %v274_v12 = vcvt.f32.s32 %v268_v10 }
  0xb2   : > { %v270_v11 = vsel %vm269_vm1, %v265_v9, inf }
  0xb3   : > { %271 = vmin.xlane.f32.xlu0 %v270_v11  ;;  %v275_v14 = vshll.u32 %v274_v12, 16  ;;  %v255_v11 = vld [vmem:[%s249_s12] sm:$0xff] }
 0x140   : > { %v272_v13 = vpop.xlane.xlu0 %271 }
 0x141   : > { %v273_v15 = vcvt.f32.s32 %v272_v13 }
 0x143   : > { %v1001_v16 = vadd.s32 %v275_v14, %v273_v15  ;;  %v901_v15 = vmov 0  }
 0x144   : > { %825 = vset.pattern.permute.xlu1 %v901_v15 }
 0x145   : > { %vm277_vm2 = vcmp.eq.s32.totalorder %v997_v4, %v1001_v16 }
 0x146   : > { %v1009_v17 = vsel %vm277_vm2, 2147483647, %v997_v4  ;;  %v280_v13 = vsel %vm277_vm2, %v255_v11, inf }
 0x147   : > { %v285_v18 = vsel %vm261_vm0, %v1009_v17, 2147483647  ;;  %v281_v14 = vsel %vm261_vm0, %v280_v13, inf }
 0x148   : > { %v287_v19 = vshra.s32 %v285_v18, 16  ;;  %v286_v21 = vand.u32 65535, %v285_v18  ;;  %v405_v18 = vld [vmem:[%s253_s15] sm:$0xff]  ;;  %s745_s15 = sshll.u32 %s239_s14, 3 }
 0x149   : > { %s241_s17 = scalar_lea.vmem [#allocation2], %s745_s15 }
 0x14a   : > { %v289_v20 = vcvt.s32.f32 %v287_v19  ;;  %v288_v23 = vcvt.s32.f32 %v286_v21  ;;  %s658_s23 = sshll.u32 %s241_s17, 4  ;;  %s1180_s23 = int_to_ptr.vmem [resolvable:$true] %s658_s23 }
 0x14b   : > { %s836_s6 = scalar_lea.vmem %s1180_s23, 128  ;;  %p843_p0 = scmp.lt.s32.totalorder %s1180_s23, %s841_s8 }
 0x14c   : > { %290 = vmin.xlane.f32.xlu1 %v289_v20  ;;  %p837_p11 = scmp.ne.s32.totalorder %s1180_s23, %s836_s6  ;;  %p844_p1 = scmp.lt.s32.totalorder %s842_s9, %s836_s6 }
 0x14e   : > { %p838_p12 = pnand %p837_p11, %p978_p5  ;;  %p845_p2 = por %p844_p1, %p843_p0 }
 0x150   : > { %p839_p13 = pneg %p838_p12 }
 0x152   : > { %p846_p3 = pnand %p845_p2, %p839_p13 }
 0x1d9   : > { %v291_v22 = vpop.xlane.xlu1 %290 }
 0x1da   : > { %vm292_vm3 = vcmp.eq.f32.partialorder %v289_v20, %v291_v22  ;;  %v297_v25 = vcvt.f32.s32 %v291_v22 }
 0x1db   : > { %v293_v24 = vsel %vm292_vm3, %v288_v23, inf }
 0x1dc   : > { %294 = vmin.xlane.f32.xlu1 %v293_v24  ;;  %v298_v27 = vshll.u32 %v297_v25, 16 }
 0x269   : > { %v295_v26 = vpop.xlane.xlu1 %294 }
 0x26a   : > { %v296_v28 = vcvt.f32.s32 %v295_v26 }
 0x26c   : > { %v1013_v29 = vadd.s32 %v298_v27, %v296_v28 }
 0x26e   : > { %vm300_vm4 = vcmp.eq.s32.totalorder %v1009_v17, %v1013_v29 }
 0x26f   : > { %v1021_v30 = vsel %vm300_vm4, 2147483647, %v1009_v17  ;;  %v303_v25 = vsel %vm300_vm4, %v255_v11, inf }
 0x270   : > { %v308_v31 = vsel %vm261_vm0, %v1021_v30, 2147483647  ;;  %v304_v26 = vsel %vm261_vm0, %v303_v25, inf }
 0x271   : > { %v310_v32 = vshra.s32 %v308_v31, 16  ;;  %v309_v34 = vand.u32 65535, %v308_v31 }
 0x273   : > { %v312_v33 = vcvt.s32.f32 %v310_v32  ;;  %v311_v36 = vcvt.s32.f32 %v309_v34 }
 0x275   : > { %313 = vmin.xlane.f32.xlu0 %v312_v33 }
 0x302   : > { %v314_v35 = vpop.xlane.xlu0 %313 }
 0x303   : > { %vm315_vm5 = vcmp.eq.f32.partialorder %v312_v33, %v314_v35  ;;  %v320_v38 = vcvt.f32.s32 %v314_v35 }
 0x304   : > { %v316_v37 = vsel %vm315_vm5, %v311_v36, inf }
 0x305   : > { %317 = vmin.xlane.f32.xlu1 %v316_v37  ;;  %v321_v40 = vshll.u32 %v320_v38, 16 }
 0x392   : > { %v318_v39 = vpop.xlane.xlu1 %317 }
 0x393   : > { %v319_v41 = vcvt.f32.s32 %v318_v39 }
 0x395   : > { %v1025_v42 = vadd.s32 %v321_v40, %v319_v41 }
 0x397   : > { %vm323_vm6 = vcmp.eq.s32.totalorder %v1021_v30, %v1025_v42 }
 0x398   : > { %v1033_v43 = vsel %vm323_vm6, 2147483647, %v1021_v30  ;;  %v326_v19 = vsel %vm323_vm6, %v255_v11, inf }
 0x399   : > { %v331_v44 = vsel %vm261_vm0, %v1033_v43, 2147483647  ;;  %v327_v20 = vsel %vm261_vm0, %v326_v19, inf  ;;  %v403_v19 = vld [vmem:[%s1227_s3] sm:$0xff] }
 0x39a   : > { %v333_v45 = vshra.s32 %v331_v44, 16  ;;  %v332_v47 = vand.u32 65535, %v331_v44  ;;  %v278_v44 = vand.u32 4294967280, %v1001_v16 }
 0x39c   : > { %v335_v46 = vcvt.s32.f32 %v333_v45  ;;  %v334_v49 = vcvt.s32.f32 %v332_v47  ;;  %v301_v45 = vand.u32 4294967280, %v1013_v29 }
 0x39e   : > { %336 = vmin.xlane.f32.xlu0 %v335_v46 }
 0x42b   : > { %v337_v48 = vpop.xlane.xlu0 %336 }
 0x42c   : > { %vm338_vm7 = vcmp.eq.f32.partialorder %v335_v46, %v337_v48  ;;  %v343_v51 = vcvt.f32.s32 %v337_v48  ;;  %v324_v46 = vand.u32 4294967280, %v1025_v42 }
 0x42d   : > { %v339_v50 = vsel %vm338_vm7, %v334_v49, inf }
 0x42e   : > { %340 = vmin.xlane.f32.xlu1 %v339_v50  ;;  %v344_v53 = vshll.u32 %v343_v51, 16 }
 0x4bb   : > { %v341_v52 = vpop.xlane.xlu1 %340 }
 0x4bc   : > { %v342_v54 = vcvt.f32.s32 %v341_v52 }
 0x4be   : > { %v1037_v55 = vadd.s32 %v344_v53, %v342_v54 }
 0x4c0   : > { %vm346_vm8 = vcmp.eq.s32.totalorder %v1033_v43, %v1037_v55  ;;  %v347_v47 = vand.u32 4294967280, %v1037_v55 }
 0x4c1   : > { %v1045_v56 = vsel %vm346_vm8, 2147483647, %v1033_v43  ;;  %v349_v27 = vsel %vm346_vm8, %v255_v11, inf }
 0x4c2   : > { %v354_v57 = vsel %vm261_vm0, %v1045_v56, 2147483647  ;;  %v350_v28 = vsel %vm261_vm0, %v349_v27, inf }
 0x4c3   : > { %v356_v58 = vshra.s32 %v354_v57, 16  ;;  %v355_v60 = vand.u32 65535, %v354_v57  ;;  %v518_v57 = vld [vmem:[%s1228_s4] sm:$0xff] }
 0x4c5   : > { %v358_v59 = vcvt.s32.f32 %v356_v58  ;;  %v357_v62 = vcvt.s32.f32 %v355_v60  ;;  %v519_v58 = vld [vmem:[%s1228_s4 + $0x8] sm:$0xff]  ;;  %v902_v60 = vmov 0.0|0.0  }
 0x4c6   : > { %771 = vmatprep.subr.bf16.mxu0 %v902_v60 }
 0x4c7   : > { %359 = vmin.xlane.f32.xlu0 %v358_v59 }
 0x554   : > { %v360_v61 = vpop.xlane.xlu0 %359 }
 0x555   : > { %vm361_vm9 = vcmp.eq.f32.partialorder %v358_v59, %v360_v61  ;;  %v366_v2 = vcvt.f32.s32 %v360_v61  ;;  %v520_v59 = vld [vmem:[%s1228_s4 + $0x10] sm:$0xff]  ;;  %v772_v61 = vpack.c.bf16 %v519_v58, %v518_v57 }
 0x556   : > { %v362_v63 = vsel %vm361_vm9, %v357_v62, inf  ;;  %v521_v62 = vld [vmem:[%s1228_s4 + $0x18] sm:$0xff] }
 0x557   : > { %363 = vmin.xlane.f32.xlu1 %v362_v63  ;;  %v367_v5 = vshll.u32 %v366_v2, 16  ;;  %v904_v63 = vmov 0.0   ;;  %773 = vmatpush3.bf16.msra.mxu0 %v772_v61  ;;  %v775_v1 = vpack.c.bf16 %v521_v62, %v520_v59  ;;  %v412_v2 = vshrl.u32 %v256_v0, 7 }
 0x558   : > { %768 = vmatprep.mubr.msk.f32.mxu0 %vm903_vm14, %v904_v63  ;;  %774 = vmatprep.subr.bf16.mxu0 %v902_v60 }
 0x559   : > { %v453_v27 = vsub.s32 7, %v412_v2 }
 0x55b   : > { %776 = vmatpush3.bf16.msra.mxu0 %v775_v1 }
 0x5e4   : > { %v364_v3 = vpop.xlane.xlu1 %363 }
 0x5e5   : > { %v365_v6 = vcvt.f32.s32 %v364_v3  ;;  %v413_v3 = vsub.s32 4, %v412_v2 }
 0x5e7   : > { %v1049_v7 = vadd.s32 %v367_v5, %v365_v6  ;;  %v404_v5 = vld [vmem:[%s1227_s3 + $0x8] sm:$0x7f]  ;;  %v427_v6 = vsub.s32 5, %v412_v2 }
 0x5e9   : > { %vm369_vm10 = vcmp.eq.s32.totalorder %v1045_v56, %v1049_v7  ;;  %v370_v49 = vand.u32 4294967280, %v1049_v7  ;;  %v428_v13 = vrot.slane %v404_v5, %v427_v6 }
 0x5ea   : > { %v1057_v8 = vsel %vm369_vm10, 2147483647, %v1045_v56  ;;  %v372_v31 = vsel %vm369_vm10, %v255_v11, inf }
 0x5eb   : > { %v377_v9 = vsel %vm261_vm0, %v1057_v8, 2147483647  ;;  %v373_v32 = vsel %vm261_vm0, %v372_v31, inf }
 0x5ec   : > { %v379_v10 = vshra.s32 %v377_v9, 16  ;;  %v378_v21 = vand.u32 65535, %v377_v9  ;;  %v414_v9 = vrot.slane %v404_v5, %v413_v3 }
 0x5ee   : > { %v381_v12 = vcvt.s32.f32 %v379_v10  ;;  %v380_v23 = vcvt.s32.f32 %v378_v21 }
 0x5f0   : > { %382 = vmin.xlane.f32.xlu0 %v381_v12 }
 0x5f4   : > { %282 = vmin.xlane.f32.xlu0 %v281_v14 }
 0x60a   : > { %422 = vperm.xlu0 %826, %v405_v18  }
 0x629   : > { %328 = vmin.xlane.f32.xlu0 %v327_v20 }
 0x67d   : > { %v383_v22 = vpop.xlane.xlu0 %382 }
 0x67e   : > { %vm384_vm11 = vcmp.eq.f32.partialorder %v381_v12, %v383_v22  ;;  %v389_v33 = vcvt.f32.s32 %v383_v22 }
 0x67f   : > { %v385_v24 = vsel %vm384_vm11, %v380_v23, inf }
 0x680   : > { %386 = vmin.xlane.f32.xlu1 %v385_v24  ;;  %v390_v35 = vshll.u32 %v389_v33, 16  ;;  %v454_v33 = vrot.slane %v403_v19, %v453_v27 }
 0x681   : > { %v283_v12 = vpop.xlane.xlu0 %282 }
 0x689   : > { %v423_v20 = vpop.permute.xlu0 %422 }
 0x68a   : > { %v429_v0 = vmul.f32 %v428_v13, %v423_v20  ;;  %v500_v20 = vrot.slane %v403_v19, %v427_v6 }
 0x691   : > { %408 = vperm.xlu1 %825, %v405_v18   ;;  %v434_v18 = vsub.s32 0, %v412_v2 }
 0x693   : > { %v435_v21 = vrot.slane %v403_v19, %v434_v18 }
 0x6b5   : > { %305 = vmin.xlane.f32.xlu1 %v304_v26  ;;  %v447_v26 = vsub.s32 1, %v412_v2 }
 0x6b6   : > { %v329_v57 = vpop.xlane.xlu0 %328 }
 0x6b7   : > { %v480_v63 = vrot.slane %v404_v5, %v447_v26 }
 0x6b9   : > { %351 = vmin.xlane.f32.xlu1 %v350_v28 }
 0x6bd   : > { %374 = vmin.xlane.f32.xlu1 %v373_v32  ;;  %v448_v32 = vrot.slane %v403_v19, %v447_v26 }
 0x70d   : > { %v387_v34 = vpop.xlane.xlu1 %386 }
 0x70e   : > { %v388_v36 = vcvt.f32.s32 %v387_v34 }
 0x710   : > { %v1089_v37 = vadd.s32 %v390_v35, %v388_v36  ;;  %v460_v35 = vsub.s32 2, %v412_v2 }
 0x711   : > { %v409_v10 = vpop.permute.xlu1 %408 }
 0x712   : > { %v1092_v38 = vand.u32 4294967280, %v1089_v37  ;;  %vm392_vm12 = vcmp.eq.s32.totalorder %v1057_v8, %v1089_v37  ;;  %v415_v15 = vmul.f32 %v414_v9, %v409_v10  ;;  %v487_v10 = vrot.slane %v403_v19, %v413_v3 }
 0x713   : > { %v395_v39 = vsel %vm392_vm12, %v255_v11, inf  ;;  %v418_v11 = vsub.s32 6, %v412_v2 }
 0x714   : > { %vm399_vm13 = vcmp.eq.f32.partialorder %v1092_v38, 0.0  ;;  %v396_v40 = vsel %vm261_vm0, %v395_v39, inf }
 0x715   : > { %v400_v41 = vsel %vm399_vm13, 1.0, %v1092_v38  ;;  %397 = vmin.xlane.f32.xlu1 %v396_v40  ;;  %v419_v14 = vrot.slane %v404_v5, %v418_v11  ;;  %v441_v25 = vrot.slane %v403_v19, %v418_v11 }
 0x716   : > { %832 = vrcp.f32 %v400_v41  ;;  %v461_v41 = vrot.slane %v403_v19, %v460_v35 }
 0x717   : > { %v420_v22 = vadd.f32 %v419_v14, %v415_v15  ;;  %v442_v31 = vmul.f32 %v441_v25, %v283_v12  ;;  %v493_v14 = vrot.slane %v404_v5, %v460_v35 }
 0x719   : > { %v430_v24 = vadd.f32 %v429_v0, %v420_v22 }
 0x720   : > { %v1106_v48 = vpop.eup %832 }
 0x721   : > { %v1110_v50 = vmul.f32 %v1106_v48, %v278_v44  ;;  %v1113_v51 = vmul.f32 %v1106_v48, %v301_v45  ;;  %v1116_v52 = vmul.f32 %v1106_v48, %v324_v46  ;;  %v1119_v53 = vmul.f32 %v1106_v48, %v347_v47 }
 0x722   : > { %v1122_v54 = vmul.f32 %v1106_v48, %v370_v49  ;;  %v467_v46 = vrot.slane %v404_v5, %v434_v18  ;;  %v473_v49 = vsub.s32 3, %v412_v2  ;;  %v496_v0 = vmul.f32 %v1106_v48, %v1092_v38  ;;  %v749_v38 = vld [vmem:[%s1228_s4 + $0x20] ss:$0 sm:$0xff] }
 0x723   : > { %v436_v23 = vmul.f32 %v435_v21, %v1110_v50  ;;  %v449_v39 = vmul.f32 %v448_v32, %v1113_v51  ;;  %v462_v47 = vmul.f32 %v461_v41, %v1116_v52 }
 0x724   : > { %v468_v59 = vmul.f32 %v467_v46, %v329_v57  ;;  %v474_v60 = vrot.slane %v403_v19, %v473_v49  ;;  %v488_v13 = vmul.f32 %v487_v10, %v1122_v54  ;;  %v506_v22 = vrot.slane %v404_v5, %v473_v49 }
 0x725   : > { %v437_v28 = vadd.f32 %v436_v23, %v430_v24  ;;  %v501_v23 = vmul.f32 %v500_v20, %v496_v0 }
 0x726   : > { %v475_v62 = vmul.f32 %v474_v60, %v1119_v53 }
 0x727   : > { %v443_v36 = vadd.f32 %v442_v31, %v437_v28 }
 0x729   : > { %v450_v44 = vadd.f32 %v449_v39, %v443_v36 }
 0x742   : > { %v306_v34 = vpop.xlane.xlu1 %305 }
 0x743   : > { %v455_v40 = vmul.f32 %v454_v33, %v306_v34 }
 0x745   : > { %v456_v45 = vadd.f32 %v455_v40, %v450_v44  ;;  %v905_v44 = vmov 2  }
 0x746   : > { %v352_v1 = vpop.xlane.xlu1 %351 }
 0x747   : > { %v463_v58 = vadd.f32 %v462_v47, %v456_v45  ;;  %v481_v11 = vmul.f32 %v480_v63, %v352_v1  ;;  %v906_v45 = vmov 5   ;;  %v907_v47 = vmov 3  }
 0x749   : > { %v469_v61 = vadd.f32 %v468_v59, %v463_v58 }
 0x74a   : > { %v375_v15 = vpop.xlane.xlu1 %374 }
 0x74b   : > { %v476_v9 = vadd.f32 %v475_v62, %v469_v61  ;;  %v494_v2 = vmul.f32 %v493_v14, %v375_v15 }
 0x74d   : > { %v482_v12 = vadd.f32 %v481_v11, %v476_v9 }
 0x74f   : > { %v489_v18 = vadd.f32 %v488_v13, %v482_v12 }
 0x751   : > { %v495_v21 = vadd.f32 %v494_v2, %v489_v18 }
 0x753   : > { %v502_v25 = vadd.f32 %v501_v23, %v495_v21 }
 0x7a2   : > { %v398_v24 = vpop.xlane.xlu1 %397 }
 0x7a3   : > { %v507_v26 = vmul.f32 %v506_v22, %v398_v24 }
 0x7a5   : > { %v508_v27 = vadd.f32 %v507_v26, %v502_v25 }
 0x7a7   : > { %v510_v3 = vmul.f32 0.044715, %v508_v27  ;;  %v509_v35 = vmul.f32 0.5, %v508_v27 }
 0x7a9   : > { %v511_v28 = vmul.f32 %v510_v3, %v508_v27 }
 0x7ab   : > { %v512_v31 = vmul.f32 %v511_v28, %v508_v27 }
 0x7ad   : > { %v513_v32 = vadd.f32 %v512_v31, %v508_v27 }
 0x7af   : > { %v514_v33 = vmul.f32 0.7978846, %v513_v32 }
 0x7b1   : > { %834 = vtanh.f32 %v514_v33 }
 0x7bb   : > { %v835_v34 = vpop.eup %834 }
 0x7bc   : > { %v516_v6 = vadd.f32 1.0, %v835_v34 }
 0x7be   : > { %v517_v19 = vmul.f32 %v516_v6, %v509_v35 }
 0x7c0   : > { %769 = vmatmul.mubr.msk.f32.vlgmr.msra.gmra.mrb[0].mxu0 %vm527_vm15, %v517_v19 }
 0x893   : > { %v597_v48 = vpop.f32.mrb[0].mxu0 }
 0x894   : > { %v598_v5 = vadd.f32 %v749_v38, %v597_v48  ;;  %v770_v36 = vpop.f32.mrb[1].mxu0 }
 0x896   : > { %v608_v39 = vsub.f32 %v598_v5, %v1113_v51  ;;  %v601_v40 = vsub.f32 %v598_v5, %v1110_v50  ;;  %v615_v41 = vsub.f32 %v598_v5, %v1116_v52  ;;  %v622_v46 = vsub.f32 %v598_v5, %v1119_v53 }
 0x897   : > { %v629_v49 = vsub.f32 %v598_v5, %v1122_v54  ;;  %v908_v51 = vmov 4   ;;  %v636_v50 = vsub.f32 %v598_v5, %v496_v0 }
 0x898   : > { %611 = vperm.xlu0 %826, %v608_v39   ;;  %604 = vperm.xlu1 %825, %v601_v40  }
 0x89c   : > { %827 = vset.pattern.permute.xlu1 %v905_v44  ;;  %831 = vset.pattern.permute.xlu0 %v906_v45 }
 0x89d   : > { %618 = vperm.xlu1 %827, %v615_v41  }
 0x8a1   : > { %828 = vset.pattern.permute.xlu1 %v907_v47 }
 0x8a2   : > { %625 = vperm.xlu1 %828, %v622_v46  }
 0x8a6   : > { %829 = vset.pattern.permute.xlu1 %v908_v51 }
 0x8a7   : > { %632 = vperm.xlu1 %829, %v629_v49  }
 0x8ab   : > { %830 = vset.pattern.permute.xlu1 %v906_v45 }
 0x8ac   : > { %639 = vperm.xlu1 %830, %v636_v50  }
 0x917   : > { %v605_v52 = vpop.permute.xlu1 %604  ;;  %v612_v59 = vpop.permute.xlu0 %611 }
 0x918   : > { %v607_v53 = vsel %vm277_vm2, %v605_v52, -10.0 }
 0x919   : > { %v614_v54 = vsel %vm300_vm4, %v612_v59, %v607_v53 }
 0x91c   : > { %v619_v57 = vpop.permute.xlu1 %618 }
 0x91d   : > { %v621_v61 = vsel %vm323_vm6, %v619_v57, %v614_v54 }
 0x921   : > { %v626_v58 = vpop.permute.xlu1 %625 }
 0x922   : > { %v628_v62 = vsel %vm346_vm8, %v626_v58, %v621_v61 }
 0x926   : > { %v633_v60 = vpop.permute.xlu1 %632 }
 0x927   : > { %v635_v4 = vsel %vm369_vm10, %v633_v60, %v628_v62 }
 0x92b   : > { %v640_v16 = vpop.permute.xlu1 %639 }
 0x92c   : > { %v642_v17 = vsel %vm392_vm12, %v640_v16, %v635_v4 }
 0x92d   : > { %643 = vst.msk [vmem:[%s241_s17] sm:$0xff] %vm261_vm0, %v642_v17 }
 0x92e   : > { %849 = shalt.err (!%p846_p3)
}
 0x92f   : > { %s850_s10 = scalar_lea.hbm %s1178_s30, 128  ;;  %s854_s13 = scalar_lea.hbm %s1229_s5, 256 }
 0x930   : > { %p851_p4 = scmp.ne.s32.totalorder %s1178_s30, %s850_s10  ;;  %p855_p9 = scmp.lt.u32.totalorder %s1178_s30, %s1229_s5 }
 0x931   : > { %p856_p10 = scmp.lt.u32.totalorder %s854_s13, %s850_s10  ;;  %p858_p12 = scmp.lt.u32.totalorder %s850_s10, %s1178_s30 }
 0x932   : > { %p852_p7 = pnand %p851_p4, %p978_p5 }
 0x933   : > { %p857_p11 = por %p856_p10, %p855_p9 }
 0x934   : > { %p853_p8 = pneg %p852_p7 }
 0x935   : > { %p859_p13 = por %p858_p12, %p857_p11 }
 0x937   : > { %p860_p0 = pnand %p859_p13, %p853_p8 }
 0x939   : > { %863 = shalt.err (!%p860_p0)
}
 0x93a   : > { %777 = dma.vmem_to_hbm [thread:$0]  (%p978_p5), %s1180_s23, 128, %s1178_s30, %s645_s22  }
 0x93b PF: > { %p783_p1 = scmp.ge.s32.totalorder %s898_s21, 2  ;;  %s670_s16 = sand.u32 1, %s886_s18  }
 0x93c   : > { %s671_s17 = scalar_lea.sflag [#allocation3], %s670_s16 }
 0x93d   : > { %p780_p2 = pnand %p783_p1, %p982_p6 }
 0x93f   : > { %881 = dma.done.wait (!%p780_p2), %s671_s17, 128  }
 0x940   : > { %883 = vsyncadd (!%p780_p2), %s671_s17, 4294967168  ;;  %p15_p3 = scmp.ge.s32.totalorder %s965_s24, 4   ;;  %s1232_s18 = smov %s890_s19 }
 0x941   : > { %s1233_s19 = smov %s894_s20  ;;  %s1234_s20 = smov %s976_s27 }
 0x942   : > { %s1235_s21 = smov %s965_s24  ;;  %17 = sbr.rel (!%p15_p3) target bundleno = 3 (0x3), region = 81 }
 0x949   :  { %676 = vsyncpa [#allocation3], 1 }
 0x94a   :  { %678 = vsyncpa [#allocation3 + $0x1], 1 }

</bundles_post_ra>
